<compile_context>
chip_gen: v7x
topology: tpu7x:2x2x1
jax: 0.10.0
libtpu: 0.0.40
codegen_flags: <defaults>
</compile_context>

<pallas_src>
import jax
import jax.numpy as jnp
from jax.experimental import pallas as pl
from jax.experimental.pallas import tpu as pltpu


def _weighted_layer_sum_kernel(p_ref, h_ref, o_ref):
    """p_ref: (L,)  f32 softmax probabilities in SMEM (scalar-prefetched).
    h_ref:   (L, tS, H) full layer stack for one sequence tile in VMEM.
    o_ref:   (tS, H) output tile (written once per grid step).
    """
    num_layers = h_ref.shape[0]  # static
    acc = p_ref[0] * h_ref[0].astype(jnp.float32)
    for j in range(1, num_layers):          # small static L -> fully unrolled
        acc = acc + p_ref[j] * h_ref[j].astype(jnp.float32)
    o_ref[...] = acc.astype(o_ref.dtype)


def _vmem_limit_bytes() -> int:
    """Per-generation VMEM limit: headroom below physical capacity, capped at
    96 MiB (review guidance for v5e/v6e); conservative 64 MiB (v7x) fallback."""
    phys = 64 << 20
    try:
        info = pltpu.get_tpu_info()
        phys = int(getattr(info, "vmem_capacity_bytes", phys))
    except Exception:
        pass
    return int(min(phys - (16 << 20), 96 << 20))


def _pick_seq_tile(num_layers: int, seq_len: int, hidden: int, dtype) -> int:
    itemsize = jnp.dtype(dtype).itemsize
    # dtype-aware sublane minimum: 8 rows f32, 16 rows bf16, 32 rows int8/fp8.
    min_rows = {4: 8, 2: 16, 1: 32}.get(itemsize, 8)
    budget = _vmem_limit_bytes() - (8 << 20)     # headroom for internal scratch
    # Per sequence row: double-buffered full-L input + double-buffered output
    # + f32 accumulation headroom.
    bytes_per_row = (2 * num_layers * itemsize + 2 * itemsize + 4) * hidden
    tile = max(min_rows, budget // bytes_per_row)
    # Ensure >= 2 sequence tiles so v7x's two TensorCores both get work.
    half = ((pl.cdiv(seq_len, 2) + min_rows - 1) // min_rows) * min_rows
    tile = min(tile, 1024, half)
    return max(min_rows, (tile // min_rows) * min_rows)


def weighted_layer_sum(layer_weights: jax.Array,
                       hidden_states: jax.Array,
                       *, seq_tile: int | None = None) -> jax.Array:
    """hidden_states: (L, S, H); layer_weights: (L,). Returns (S, H)."""
    L, S, H = hidden_states.shape
    out_dtype = hidden_states.dtype
    if seq_tile is None:
        seq_tile = _pick_seq_tile(L, S, H, out_dtype)

    # Softmax hoisted out of the kernel: L scalars, computed once in f32.
    probs = jax.nn.softmax(layer_weights.astype(jnp.float32))

    grid = (pl.cdiv(S, seq_tile),)   # ragged edge block handled by Pallas
    return pl.pallas_call(
        _weighted_layer_sum_kernel,
        out_shape=jax.ShapeDtypeStruct((S, H), out_dtype),
        grid_spec=pltpu.PrefetchScalarGridSpec(
            num_scalar_prefetch=1,
            grid=grid,
            in_specs=[
                # Full layer stack for one sequence tile per grid step.
                pl.BlockSpec((L, seq_tile, H), lambda i, p: (0, i, 0)),
            ],
            out_specs=pl.BlockSpec((seq_tile, H), lambda i, p: (i, 0)),
        ),
        compiler_params=pltpu.CompilerParams(
            dimension_semantics=("parallel",),
            vmem_limit_bytes=_vmem_limit_bytes(),
        ),
    )(probs, hidden_states)


def roberta_embedder_forward(layer_weights, sentence_hidden_states,
                             hidden_size: int | None = None,
                             out_dtype=jnp.float32):
    """Emulates RobertaEmbedder.forward over per-sentence hidden-state stacks
    (each of shape (L, S_i, H)). Returns (sum_i S_i, H).

    One pallas_call per sentence: each (L, S_i, H) stack is streamed from HBM
    exactly once (no pre-kernel concat of the full dataset); only the small
    per-sentence (S_i, H) outputs are concatenated.

    # TODO(synk): text cleaning / regex sentence splitting / word segmentation /
    # tokenizer / RoBERTa encoder invocation have no Pallas equivalent; the
    # per-sentence hidden-state stacks are taken as inputs.
    """
    if not sentence_hidden_states:
        assert hidden_size is not None
        return jnp.zeros((1, hidden_size), dtype=out_dtype)
    outs = [weighted_layer_sum(layer_weights, h) for h in sentence_hidden_states]
    return outs[0] if len(outs) == 1 else jnp.concatenate(outs, axis=0)


if __name__ == "__main__":
    # Small synthetic config: num_hidden_layers=4 -> L = 5, hidden_size = 128.
    num_layers = 5
    hidden_size = 128
    seq_lens = (16, 19)      # un-aligned S=19 exercises the ragged edge block

    # Deterministic parameter init, mirroring torch.ones(L)/L in __init__.
    layer_weights = jnp.ones((num_layers,), dtype=jnp.float32) / num_layers

    key = jax.random.PRNGKey(0)
    keys = jax.random.split(key, len(seq_lens))
    sentence_hidden_states = [
        jax.random.normal(k, (num_layers, s, hidden_size), dtype=jnp.float32)
        for k, s in zip(keys, seq_lens)
    ]

    out = roberta_embedder_forward(layer_weights, sentence_hidden_states)
    out = jax.block_until_ready(out)

    # Plain-JAX reference.
    p = jax.nn.softmax(layer_weights)
    ref = jnp.concatenate(
        [jnp.sum(p[:, None, None] * h, axis=0) for h in sentence_hidden_states],
        axis=0)
    assert out.shape == (sum(seq_lens), hidden_size)
    assert jnp.allclose(out, ref, atol=1e-5, rtol=1e-5)

    # bf16 path (exercises the 16-row sublane minimum + f32 accumulation).
    hs_bf16 = [h.astype(jnp.bfloat16) for h in sentence_hidden_states]
    out_bf16 = jax.block_until_ready(
        roberta_embedder_forward(layer_weights, hs_bf16))
    ref_bf16 = jnp.concatenate(
        [jnp.sum(p[:, None, None] * h.astype(jnp.float32), axis=0)
         for h in hs_bf16], axis=0)
    assert out_bf16.dtype == jnp.bfloat16
    assert jnp.allclose(out_bf16.astype(jnp.float32), ref_bf16,
                        atol=2e-2, rtol=2e-2)

    print("KERNEL_OK")
</pallas_src>

<mosaic_0001>
module attributes {stable_mosaic.version = 11 : i64} {
  func.func @_weighted_layer_sum_kernel(%arg0: i32, %arg1: memref<5xf32, #tpu.memory_space<smem>>, %arg2: memref<5x8x128xf32, #tpu.memory_space<vmem>>, %arg3: memref<8x128xf32, #tpu.memory_space<vmem>>) attributes {dimension_semantics = [#tpu.dimension_semantics<parallel>], iteration_bounds = array<i64: 2>, scalar_prefetch = 1 : i64, scratch_operands = 0 : i64, tpu.core_type = #tpu.core_type<tc>, window_params = [{transform_indices = @transform_0, window_bounds = array<i64: 5, 8, 128>}, {transform_indices = @transform_1, window_bounds = array<i64: 8, 128>}]} {
    %c0 = arith.constant 0 : index
    %0 = memref.load %arg1[%c0] : memref<5xf32, #tpu.memory_space<smem>>
    %c0_0 = arith.constant 0 : index
    %c0_1 = arith.constant 0 : index
    %c0_2 = arith.constant 0 : index
    %1 = vector.load %arg2[%c0_0, %c0_1, %c0_2] : memref<5x8x128xf32, #tpu.memory_space<vmem>>, vector<1x8x128xf32>
    %2 = vector.shape_cast %1 : vector<1x8x128xf32> to vector<8x128xf32>
    %3 = vector.broadcast %0 : f32 to vector<8x128xf32>
    %4 = arith.mulf %3, %2 : vector<8x128xf32>
    %c1 = arith.constant 1 : index
    %5 = memref.load %arg1[%c1] : memref<5xf32, #tpu.memory_space<smem>>
    %c1_3 = arith.constant 1 : index
    %c0_4 = arith.constant 0 : index
    %c0_5 = arith.constant 0 : index
    %6 = vector.load %arg2[%c1_3, %c0_4, %c0_5] : memref<5x8x128xf32, #tpu.memory_space<vmem>>, vector<1x8x128xf32>
    %7 = vector.shape_cast %6 : vector<1x8x128xf32> to vector<8x128xf32>
    %8 = vector.broadcast %5 : f32 to vector<8x128xf32>
    %9 = arith.mulf %8, %7 : vector<8x128xf32>
    %10 = arith.addf %4, %9 : vector<8x128xf32>
    %c2 = arith.constant 2 : index
    %11 = memref.load %arg1[%c2] : memref<5xf32, #tpu.memory_space<smem>>
    %c2_6 = arith.constant 2 : index
    %c0_7 = arith.constant 0 : index
    %c0_8 = arith.constant 0 : index
    %12 = vector.load %arg2[%c2_6, %c0_7, %c0_8] : memref<5x8x128xf32, #tpu.memory_space<vmem>>, vector<1x8x128xf32>
    %13 = vector.shape_cast %12 : vector<1x8x128xf32> to vector<8x128xf32>
    %14 = vector.broadcast %11 : f32 to vector<8x128xf32>
    %15 = arith.mulf %14, %13 : vector<8x128xf32>
    %16 = arith.addf %10, %15 : vector<8x128xf32>
    %c3 = arith.constant 3 : index
    %17 = memref.load %arg1[%c3] : memref<5xf32, #tpu.memory_space<smem>>
    %c3_9 = arith.constant 3 : index
    %c0_10 = arith.constant 0 : index
    %c0_11 = arith.constant 0 : index
    %18 = vector.load %arg2[%c3_9, %c0_10, %c0_11] : memref<5x8x128xf32, #tpu.memory_space<vmem>>, vector<1x8x128xf32>
    %19 = vector.shape_cast %18 : vector<1x8x128xf32> to vector<8x128xf32>
    %20 = vector.broadcast %17 : f32 to vector<8x128xf32>
    %21 = arith.mulf %20, %19 : vector<8x128xf32>
    %22 = arith.addf %16, %21 : vector<8x128xf32>
    %c4 = arith.constant 4 : index
    %23 = memref.load %arg1[%c4] : memref<5xf32, #tpu.memory_space<smem>>
    %c4_12 = arith.constant 4 : index
    %c0_13 = arith.constant 0 : index
    %c0_14 = arith.constant 0 : index
    %24 = vector.load %arg2[%c4_12, %c0_13, %c0_14] : memref<5x8x128xf32, #tpu.memory_space<vmem>>, vector<1x8x128xf32>
    %25 = vector.shape_cast %24 : vector<1x8x128xf32> to vector<8x128xf32>
    %26 = vector.broadcast %23 : f32 to vector<8x128xf32>
    %27 = arith.mulf %26, %25 : vector<8x128xf32>
    %28 = arith.addf %22, %27 : vector<8x128xf32>
    %c0_15 = arith.constant 0 : index
    %c0_16 = arith.constant 0 : index
    %29 = vector.load %arg3[%c0_15, %c0_16] : memref<8x128xf32, #tpu.memory_space<vmem>>, vector<8x128xf32>
    tpu.vector_store %arg3[%c0_15, %c0_16], %28 {strides = array<i32>} : memref<8x128xf32, #tpu.memory_space<vmem>>, vector<8x128xf32>,
    return
  }
  func.func @transform_0(%arg0: i32, %arg1: memref<5xf32, #tpu.memory_space<smem>>) -> (i32, i32, i32) {
    %c0_i32 = arith.constant 0 : i32
    %c0_i32_0 = arith.constant 0 : i32
    %c0_i32_1 = arith.constant 0 : i32
    return %c0_i32, %arg0, %c0_i32_0 : i32, i32, i32
  }
  func.func @transform_1(%arg0: i32, %arg1: memref<5xf32, #tpu.memory_space<smem>>) -> (i32, i32) {
    %c0_i32 = arith.constant 0 : i32
    %c0_i32_0 = arith.constant 0 : i32
    return %arg0, %c0_i32 : i32, i32
  }
}

</mosaic_0001>

<bundles_post_ra>
// kernel: tpu_custom_call.1
= control target key start
LH: loop header
LB: loop body
LE: loop exit
PB: predicated region body
PF: predicated region fallthrough
CT: control target
= control target key end

     0   :  { %s622_s0 = inlined_call_operand.hbm [shape: f32[5], index: 0, kind: input, shape index: {}]   ;;  %s623_s1 = inlined_call_operand.hbm [shape: f32[5,16,128], index: 1, kind: input, shape index: {}]   ;;  %s624_s2 = inlined_call_operand.hbm [shape: f32[16,128], index: 2, kind: output, shape index: {}]  }
   0x1   :  { %s322_s11 = scalar_lea.hbm %s622_s0, 16 }
   0x2   :  { %p323_p0 = scmp.ne.s32.totalorder %s622_s0, %s322_s11  ;;  %p326_p1 = scmp.lt.u32.totalorder %s322_s11, %s622_s0 }
   0x4   :  { %p328_p2 = pnand %p326_p1, %p323_p0 }
   0x6   :  { %331 = shalt.err (!%p328_p2)  }
   0x7   :  { %s432_s16 = smov [#allocation3]  }
   0x8   :  { %8 = dma.hbm_to_smem %s622_s0, 16, %s432_s16, [#allocation2] }
   0x9   :  { %406 = dma.done.wait [#allocation2], 16 }
   0xa   :  { %407 = vsyncadd [#allocation2], 4294967280 }
   0xb   :  { %10 = sfence }
   0xc   :  { %11 = vsyncpa [#allocation5], 0 }
   0xd   :  { %13 = vsyncpa [#allocation5 + $0x1], 0 }
   0xe   :  { %14 = vsyncpa [#allocation6], 0 }
   0xf   :  { %16 = vsyncpa [#allocation6 + $0x1], 0  ;;  %s465_s19 = smov 0   ;;  %s467_s20 = smov 0  }
  0x10   :  { %s469_s21 = smov 0   ;;  %s471_s22 = smov 0  }
  0x11 LB: > { %s486_s0 = sadd.s32 4294967295, %s430_s22   ;;  %s252_s23 = sadd.s32 4294967294, %s430_s22   ;;  %s430_s22 = sphi %s471_s22, %s637_s22   ;;  %s426_s21 = sphi %s469_s21, %s636_s21   ;;  %s422_s20 = sphi %s467_s20, %s635_s20   ;;  %s418_s19 = sphi %s465_s19, %s634_s19  }
  0x12   : > { %s490_s24 = sadd.s32 1, %s430_s22   ;;  %s29_s25 = sadd.s32 1, %s426_s21 }
  0x13   : > { %s26_s26 = ssub.s32 %s430_s22, %s490_s24  ;;  %p36_p3 = scmp.ne.s32.totalorder %s426_s21, %s422_s20 }
  0x14   : > { %p27_p4 = scmp.eq.s32.totalorder %s26_s26, 0  ;;  %p37_p5 = scmp.eq.s32.totalorder %s430_s22, 0 }
  0x15   : > { %p42_p6 = scmp.ne.s32.totalorder %s422_s20, %s418_s19  ;;  %p43_p7 = scmp.eq.s32.totalorder %s486_s0, 0 }
  0x16   : > { %s502_s27 = scalar_select %p27_p4, %s426_s21, %s29_s25  }
  0x17   : > { %p38_p8 = por %p37_p5, %p36_p3  ;;  %p504_p9 = por %p43_p7, %p42_p6 }
  0x18   : > { %p66_p10 = scmp.eq.s32.totalorder %s486_s0, 1  ;;  %p72_p11 = scmp.eq.s32.totalorder %s252_s23, 1 }
  0x19   : > { %p284_p13 = scmp.lt.s32.totalorder %s430_s22, 2  ;;  %s92_s3 = sand.u32 1, %s426_s21  }
  0x1a   : > { %p511_p0 = por %p66_p10, %p36_p3  ;;  %p515_p1 = por %p72_p11, %p42_p6 }
  0x1b   : > { %s255_s4 = sshll.u32 %s430_s22, 7  ;;  %s270_s5 = smul.u32 40, %s92_s3 }
  0x1c   : > { %s627_s29 = scalar_select %p511_p0, 1, 0 }
  0x1d   : > { %s628_s30 = scalar_select %p515_p1, 1, 0 }
  0x1e   : > { %s524_s8 = scalar_lea.hbm %s623_s1, %s255_s4  ;;  %p526_p2 = pnand %p284_p13, %p38_p8 }
  0x1f   : > { %s96_s10 = scalar_lea.vmem [#allocation4], %s270_s5  ;;  %s533_s12 = scalar_lea.sflag [#allocation5], %s92_s3 }
  0x20   : > { %s102_s11 = sshll.u32 %s96_s10, 4  ;;  %s332_s13 = scalar_lea.hbm %s524_s8, 640  ;;  %s530_s11 = int_to_ptr.vmem [resolvable:$true] %s102_s11 }
  0x21   : > { %p333_p4 = scmp.ne.s32.totalorder %s524_s8, %s332_s13  ;;  %p334_p5 = pneg %p526_p2 }
  0x22   : > { %s337_s16 = scalar_lea.hbm %s623_s1, 1280  ;;  %p338_p8 = scmp.lt.u32.totalorder %s524_s8, %s623_s1 }
  0x23   : > { %p335_p6 = pnand %p334_p5, %p333_p4  ;;  %p339_p10 = scmp.lt.u32.totalorder %s337_s16, %s332_s13 }
  0x24   : > { %p341_p13 = scmp.lt.u32.totalorder %s332_s13, %s524_s8 }
  0x25   : > { %p336_p7 = pneg %p335_p6  ;;  %p340_p11 = por %p339_p10, %p338_p8 }
  0x27   : > { %p342_p12 = por %p341_p13, %p340_p11 }
  0x29   : > { %p343_p3 = pnand %p342_p12, %p336_p7 }
  0x2b   : > { %346 = shalt.err (!%p343_p3)
}
  0x2c   : > { %s347_s23 = scalar_lea.vmem %s530_s11, 640  ;;  %s433_s25 = smov [#allocation4]  }
  0x2d   : > { %p348_p4 = scmp.ne.s32.totalorder %s530_s11, %s347_s23  ;;  %s352_s26 = sshll.u32 %s433_s25, 4  ;;  %s353_s26 = int_to_ptr.vmem [resolvable:$false] %s352_s26 }
  0x2e   : > { %s354_s3 = scalar_lea.vmem %s353_s26, 1280  ;;  %p355_p0 = scmp.lt.s32.totalorder %s530_s11, %s353_s26 }
  0x2f   : > { %p350_p6 = pnand %p348_p4, %p334_p5  ;;  %p356_p8 = scmp.lt.s32.totalorder %s354_s3, %s347_s23 }
  0x31   : > { %p351_p1 = pneg %p350_p6  ;;  %p357_p10 = por %p356_p8, %p355_p0 }
  0x33   : > { %p358_p11 = pnand %p357_p10, %p351_p1 }
  0x35   : > { %361 = shalt.err (!%p358_p11)
}
  0x36   : > { %s434_s4 = smov 256   ;;  %s435_s5 = smov 128  }
  0x37   : > { %s436_s6 = smov 8   ;;  %p110_p12 = scmp.lt.s32.totalorder %s430_s22, 3 }
  0x38   : > { %279 = dma.hbm_to_vmem [thread:$0]  (!%p526_p2), %s524_s8, 640, %s530_s11, %s533_s12, %s434_s4, %s435_s5, %s436_s6  }
  0x39   : > { %p630_p3 = scmp.ge.s32.totalorder %s430_s22, 1 }
  0x3b   : > { %p111_p5 = pnand %p630_p3, %p110_p12 }
  0x3c   : > { %s565_s7 = sand.u32 (!%p111_p5), 1, %s422_s20  }
  0x3d   : > { %114 = sbr.rel (%p111_p5) target bundleno = 100 (0x64), region = 24  ;;  %s117_s13 = scalar_lea.sflag (!%p111_p5), [#allocation5], %s565_s7 }
  0x3e   : > { %s271_s10 = smul.u32 (!%p111_p5), 40, %s565_s7 }
  0x40   : > { %s120_s14 = scalar_lea.vmem (!%p111_p5), [#allocation4], %s271_s10 }
  0x44   : > { %409 = dma.done.wait (%p504_p9), %s117_s13, 640  }
  0x45   : > { %411 = vsyncadd (%p504_p9), %s117_s13, 4294966656  ;;  %s139_s8 = sld [smem:[#allocation3]]  ;;  %s258_s9 = sld [smem:[#allocation3 + $0x1]]  ;;  %v140_v0 = vld [vmem:[%s120_s14] sm:$0xff]  ;;  %v259_v2 = vld [vmem:[%s120_s14 + $0x8] sm:$0xff] }
  0x46   : > { %s260_s11 = sld [smem:[#allocation3 + $0x2]]  ;;  %s262_s12 = sld [smem:[#allocation3 + $0x3]]  ;;  %v261_v3 = vld [vmem:[%s120_s14 + $0x10] sm:$0xff]  ;;  %v263_v7 = vld [vmem:[%s120_s14 + $0x18] sm:$0xff]  ;;  %v265_v11 = vld [vmem:[%s120_s14 + $0x20] sm:$0xff] }
  0x47   : > { %s264_s15 = sld [smem:[#allocation3 + $0x4]]  ;;  %s257_s16 = sshll.u32 %s565_s7, 3 }
  0x48   : > { %s138_s28 = scalar_lea.vmem [#allocation7], %s257_s16  ;;  %s267_s18 = sshll.u32 %s486_s0, 7 }
  0x49   : > { %s182_s17 = sshll.u32 %s138_s28, 4  ;;  %s580_s26 = scalar_lea.hbm %s624_s2, %s267_s18  ;;  %s575_s17 = int_to_ptr.vmem [resolvable:$true] %s182_s17 }
  0x4a   : > { %s169_s3 = scalar_lea.sflag [#allocation6], %s565_s7  ;;  %s362_s4 = scalar_lea.vmem %s575_s17, 128 }
  0x4b   : > { %v141_v1 = vstv %s139_s8  ;;  %v146_v5 = vstv %s258_s9  ;;  %p363_p9 = scmp.ne.s32.totalorder %s575_s17, %s362_s4  ;;  %p631_p0 = scmp.ne.s32.totalorder %s627_s29, 0 }
  0x4c   : > { %v142_v4 = vmul.f32 %v141_v1, %v140_v0  ;;  %v152_v6 = vstv %s260_s11  ;;  %v147_v8 = vmul.f32 %v259_v2, %v146_v5  ;;  %v158_v10 = vstv %s262_s12  ;;  %s437_s0 = smov [#allocation7]  }
  0x4d   : > { %v153_v9 = vmul.f32 %v261_v3, %v152_v6  ;;  %v164_v12 = vstv %s264_s15  ;;  %v159_v14 = vmul.f32 %v263_v7, %v158_v10  ;;  %p364_p1 = pnand %p363_p9, %p631_p0  ;;  %s366_s5 = sshll.u32 %s437_s0, 4  ;;  %s367_s5 = int_to_ptr.vmem [resolvable:$false] %s366_s5 }
  0x4e   : > { %v148_v13 = vadd.f32 %v147_v8, %v142_v4  ;;  %v165_v16 = vmul.f32 %v265_v11, %v164_v12  ;;  %s368_s6 = scalar_lea.vmem %s367_s5, 256  ;;  %p369_p7 = scmp.lt.s32.totalorder %s575_s17, %s367_s5 }
  0x4f   : > { %p365_p2 = pneg %p364_p1  ;;  %p370_p13 = scmp.lt.s32.totalorder %s368_s6, %s362_s4 }
  0x50   : > { %v154_v15 = vadd.f32 %v153_v9, %v148_v13 }
  0x51   : > { %p371_p4 = por %p370_p13, %p369_p7 }
  0x52   : > { %v160_v17 = vadd.f32 %v159_v14, %v154_v15 }
  0x53   : > { %p372_p6 = pnand %p371_p4, %p365_p2 }
  0x54   : > { %v166_v18 = vadd.f32 %v165_v16, %v160_v17 }
  0x56   : > { %167 = vst [vmem:[%s138_s28] sm:$0xff] %v166_v18 }
  0x57   : > { %375 = shalt.err (!%p372_p6)
}
  0x58   : > { %s376_s7 = scalar_lea.hbm %s580_s26, 128  ;;  %s380_s14 = scalar_lea.hbm %s624_s2, 256 }
  0x59   : > { %p377_p8 = scmp.ne.s32.totalorder %s580_s26, %s376_s7  ;;  %p381_p12 = scmp.lt.u32.totalorder %s580_s26, %s624_s2 }
  0x5a   : > { %p382_p3 = scmp.lt.u32.totalorder %s380_s14, %s376_s7  ;;  %p384_p9 = scmp.lt.u32.totalorder %s376_s7, %s580_s26 }
  0x5b   : > { %p378_p10 = pnand %p377_p8, %p631_p0 }
  0x5c   : > { %p383_p5 = por %p382_p3, %p381_p12 }
  0x5d   : > { %p379_p11 = pneg %p378_p10 }
  0x5e   : > { %p385_p1 = por %p384_p9, %p383_p5 }
  0x60   : > { %p386_p2 = pnand %p385_p1, %p379_p11 }
  0x62   : > { %389 = shalt.err (!%p386_p2)
}
  0x63   : > { %274 = dma.vmem_to_hbm [thread:$0]  (%p631_p0), %s575_s17, 128, %s580_s26, %s169_s3  }
  0x64 PF: > { %s194_s11 = sand.u32 1, %s418_s19   ;;  %p632_p7 = scmp.ne.s32.totalorder %s628_s30, 0 }
  0x65   : > { %p633_p13 = scmp.ge.s32.totalorder %s430_s22, 2  ;;  %s195_s12 = scalar_lea.sflag [#allocation6], %s194_s11 }
  0x67   : > { %p281_p4 = pnand %p633_p13, %p632_p7 }
  0x69   : > { %413 = dma.done.wait (!%p281_p4), %s195_s12, 128  }
  0x6a   : > { %415 = vsyncadd (!%p281_p4), %s195_s12, 4294967168  ;;  %p19_p6 = scmp.ge.s32.totalorder %s490_s24, 4   ;;  %s634_s19 = smov %s422_s20 }
  0x6b   : > { %s635_s20 = smov %s426_s21  ;;  %s636_s21 = smov %s502_s27 }
  0x6c   : > { %s637_s22 = smov %s490_s24  ;;  %21 = sbr.rel (!%p19_p6) target bundleno = 17 (0x11), region = 73 }
  0x73   :  { %200 = vsyncpa [#allocation5], 1 }
  0x74   :  { %202 = vsyncpa [#allocation5 + $0x1], 1 }
  0x75   :  { %203 = vsyncpa [#allocation6], 1 }
  0x76   :  { %205 = vsyncpa [#allocation6 + $0x1], 1 }

</bundles_post_ra>
